<compile_context>
chip_gen: v7x
topology: tpu7x:2x2x1
jax: 0.10.0
libtpu: 0.0.40
codegen_flags: <defaults>
</compile_context>

<pallas_src>
import functools

import jax
import jax.numpy as jnp
from jax.experimental import pallas as pl
from jax.experimental.pallas import tpu as pltpu

LANE = 128
MAX_BLOCK_ROWS = 2048          # multiple of 32 -> legal sublane tiling for any dtype
VMEM_LIMIT_BYTES = 32 * 1024 * 1024


# ----------------------------------------------------------------------------
# layout helpers
# ----------------------------------------------------------------------------
def _as_rows128(x):
    """View a tensor as a (rows, 128) lane-dense slab (reshape; copy only if ragged)."""
    flat = x.reshape(-1)
    n = flat.shape[0]
    pad = (-n) % LANE
    if pad:
        # TODO(synk): numel not divisible by 128 falls back to a padded copy.
        flat = jnp.concatenate([flat, jnp.zeros((pad,), flat.dtype)])
    return flat.reshape(-1, LANE)


def _pick_block_rows(rows, max_block_rows):
    # Full-array block when it fits (block == full dims is always legal);
    # otherwise a fixed large block (the default is a multiple of 32, legal for
    # f32 / bf16 / int8 tiling alike).
    return rows if rows <= max_block_rows else max_block_rows


# ----------------------------------------------------------------------------
# reduction kernels (sequential grid, VMEM vector accumulator, SMEM scalar out)
# ----------------------------------------------------------------------------
def _rec_sum_kernel(x_ref, y_ref, out_ref, acc_ref, *, rows, block_rows, need_mask):
    """out = sum(|x - y|)."""
    i = pl.program_id(0)

    @pl.when(i == 0)
    def _():
        acc_ref[...] = jnp.zeros_like(acc_ref)

    diff = jnp.abs(x_ref[...].astype(jnp.float32) - y_ref[...].astype(jnp.float32))
    if need_mask:
        row = jax.lax.broadcasted_iota(jnp.int32, (block_rows, LANE), 0) + i * block_rows
        diff = jnp.where(row < rows, diff, 0.0)
    acc_ref[...] += diff

    @pl.when(i == pl.num_programs(0) - 1)
    def _():
        out_ref[0, 0] = jnp.sum(acc_ref[...])


def _weighted_rec_sum_kernel(x_ref, y_ref, w_ref, rec_ref, wrec_ref, wsum_ref,
                             acc_rec, acc_wrec, acc_wsum, *,
                             rows, block_rows, need_mask):
    """Fused single pass: rec = sum(|x-y|), wrec = sum(w*|x-y|), wsum = sum(w)."""
    i = pl.program_id(0)

    @pl.when(i == 0)
    def _():
        acc_rec[...] = jnp.zeros_like(acc_rec)
        acc_wrec[...] = jnp.zeros_like(acc_wrec)
        acc_wsum[...] = jnp.zeros_like(acc_wsum)

    x = x_ref[...].astype(jnp.float32)
    y = y_ref[...].astype(jnp.float32)
    w = w_ref[...].astype(jnp.float32)
    diff = jnp.abs(x - y)
    wdiff = w * diff
    if need_mask:
        row = jax.lax.broadcasted_iota(jnp.int32, (block_rows, LANE), 0) + i * block_rows
        valid = row < rows
        diff = jnp.where(valid, diff, 0.0)
        wdiff = jnp.where(valid, wdiff, 0.0)
        w = jnp.where(valid, w, 0.0)
    acc_rec[...] += diff
    acc_wrec[...] += wdiff
    acc_wsum[...] += w

    @pl.when(i == pl.num_programs(0) - 1)
    def _():
        rec_ref[0, 0] = jnp.sum(acc_rec[...])
        wrec_ref[0, 0] = jnp.sum(acc_wrec[...])
        wsum_ref[0, 0] = jnp.sum(acc_wsum[...])


def _kl_sum_kernel(mu_ref, lv_ref, out_ref, acc_ref, *, rows, block_rows, need_mask):
    """out = sum(0.5 * (mu^2 + exp(clip(lv)) - 1 - clip(lv))).  Clip fused in-kernel."""
    i = pl.program_id(0)

    @pl.when(i == 0)
    def _():
        acc_ref[...] = jnp.zeros_like(acc_ref)

    mu = mu_ref[...].astype(jnp.float32)
    lv = jnp.clip(lv_ref[...].astype(jnp.float32), -30.0, 20.0)
    contrib = 0.5 * (mu * mu + jnp.exp(lv) - 1.0 - lv)
    if need_mask:
        row = jax.lax.broadcasted_iota(jnp.int32, (block_rows, LANE), 0) + i * block_rows
        contrib = jnp.where(row < rows, contrib, 0.0)
    acc_ref[...] += contrib

    @pl.when(i == pl.num_programs(0) - 1)
    def _():
        out_ref[0, 0] = jnp.sum(acc_ref[...])


def _run_reduce(kernel, inputs_2d, n_out, block_rows):
    """Run a sequential-grid reduction kernel over (rows, 128) inputs."""
    rows = inputs_2d[0].shape[0]
    grid = (pl.cdiv(rows, block_rows),)
    in_specs = [pl.BlockSpec((block_rows, LANE), lambda i: (i, 0)) for _ in inputs_2d]
    out_shape = tuple(jax.ShapeDtypeStruct((1, 1), jnp.float32) for _ in range(n_out))
    out_specs = tuple(
        pl.BlockSpec(memory_space=pltpu.MemorySpace.SMEM) for _ in range(n_out)
    )
    scratch_shapes = [pltpu.VMEM((block_rows, LANE), jnp.float32) for _ in range(n_out)]
    outs = pl.pallas_call(
        kernel,
        out_shape=out_shape,
        grid=grid,
        in_specs=in_specs,
        out_specs=out_specs,
        scratch_shapes=scratch_shapes,
        compiler_params=pltpu.CompilerParams(
            dimension_semantics=("arbitrary",),
            vmem_limit_bytes=VMEM_LIMIT_BYTES,
        ),
    )(*inputs_2d)
    return [o[0, 0] for o in outs]


# ----------------------------------------------------------------------------
# posterior (minimal DiagonalGaussianDistribution, NCHW parameters)
# ----------------------------------------------------------------------------
class DiagonalGaussianDistribution:
    def __init__(self, parameters):
        # parameters: (B, 2*C, H, W) = [mean | logvar] along channels
        self.parameters = parameters
        mean, logvar_raw = jnp.split(parameters, 2, axis=1)
        self.mean = mean
        self.logvar_raw = logvar_raw                       # clip fused into the Pallas kernel
        self.logvar = jnp.clip(logvar_raw, -30.0, 20.0)    # used only by the pure-JAX reference

    def kl(self):
        return 0.5 * jnp.sum(
            self.mean ** 2 + jnp.exp(self.logvar) - 1.0 - self.logvar,
            axis=tuple(range(1, self.mean.ndim)),
        )


# ----------------------------------------------------------------------------
# Myloss wrapper
# ----------------------------------------------------------------------------
class MylossPallas:
    def __init__(self, logvar_init=0.0, kl_weight=1.0, max_block_rows=MAX_BLOCK_ROWS):
        self.kl_weight = kl_weight
        # nn.Parameter(torch.ones(()) * logvar_init) -> deterministic scalar here
        self.logvar = jnp.asarray(logvar_init, jnp.float32)
        self.max_block_rows = int(max_block_rows)

    def __call__(self, inputs, reconstructions, posteriors, split="train", weights=None):
        batch = inputs.shape[0]
        n_elem = inputs.size

        x2 = _as_rows128(inputs)
        y2 = _as_rows128(reconstructions)
        rows = x2.shape[0]
        block_rows = _pick_block_rows(rows, self.max_block_rows)
        need_mask = (rows % block_rows) != 0

        exp_lv = jnp.exp(self.logvar)

        # --- reconstruction sums ------------------------------------------------
        use_fused_weights = False
        if weights is not None:
            w_arr = jnp.asarray(weights)
            use_fused_weights = w_arr.size > 1

        if use_fused_weights:
            if w_arr.shape != inputs.shape:
                # TODO(synk): non-trivially-broadcast weights are materialized once.
                w_arr = jnp.broadcast_to(w_arr, inputs.shape)
            w2 = _as_rows128(w_arr)
            kern = functools.partial(
                _weighted_rec_sum_kernel,
                rows=rows, block_rows=block_rows, need_mask=need_mask,
            )
            rec_sum, wrec_sum, wsum = _run_reduce(kern, [x2, y2, w2], 3, block_rows)
        else:
            kern = functools.partial(
                _rec_sum_kernel,
                rows=rows, block_rows=block_rows, need_mask=need_mask,
            )
            (rec_sum,) = _run_reduce(kern, [x2, y2], 1, block_rows)
            if weights is not None:
                # scalar weight: weighted sums are analytic, zero extra HBM traffic
                w_s = jnp.asarray(weights, jnp.float32).reshape(())
                wrec_sum = w_s * rec_sum
                wsum = w_s * jnp.float32(n_elem)

        # sum(nll) = sum(|x-y|)/exp(lv) + lv * N ;  sum(w*nll) = wrec/exp(lv) + lv * sum(w)
        nll_sum = rec_sum / exp_lv + self.logvar * jnp.float32(n_elem)
        nll_loss = nll_sum / jnp.float32(batch)
        if weights is None:
            weighted_nll_loss = nll_loss
        else:
            weighted_nll_sum = wrec_sum / exp_lv + self.logvar * wsum
            weighted_nll_loss = weighted_nll_sum / jnp.float32(batch)

        # --- KL of the diagonal Gaussian posterior -------------------------------
        mu2 = _as_rows128(posteriors.mean)
        lv2 = _as_rows128(posteriors.logvar_raw)
        p_rows = mu2.shape[0]
        p_block = _pick_block_rows(p_rows, self.max_block_rows)
        p_mask = (p_rows % p_block) != 0
        kl_kern = functools.partial(
            _kl_sum_kernel, rows=p_rows, block_rows=p_block, need_mask=p_mask
        )
        (kl_sum,) = _run_reduce(kl_kern, [mu2, lv2], 1, p_block)
        kl_loss = kl_sum / jnp.float32(posteriors.mean.shape[0])

        loss = weighted_nll_loss + self.kl_weight * kl_loss
        log = {
            f"{split}/total_loss": loss,
            f"{split}/logvar": self.logvar,
            f"{split}/kl_loss": kl_loss,
            f"{split}/nll_loss": nll_loss,
            f"{split}/rec_loss": rec_sum / jnp.float32(n_elem),
        }
        return loss, log


# ----------------------------------------------------------------------------
# pure-JAX reference (correctness check)
# ----------------------------------------------------------------------------
def _reference(inputs, recon, posteriors, logvar, kl_weight, weights=None):
    rec = jnp.abs(inputs - recon)
    nll = rec / jnp.exp(logvar) + logvar
    wnll = nll if weights is None else weights * nll
    wnll_loss = jnp.sum(wnll) / wnll.shape[0]
    kl = posteriors.kl()
    kl_loss = jnp.sum(kl) / kl.shape[0]
    return wnll_loss + kl_weight * kl_loss


if __name__ == "__main__":
    key = jax.random.PRNGKey(0)
    k1, k2, k3, k4 = jax.random.split(key, 4)

    # image-like tensors (B, C, H, W) and latent posterior params (B, 2*Cz, Hz, Wz)
    inputs = jax.random.normal(k1, (2, 4, 16, 16), jnp.float32)
    reconstructions = jax.random.normal(k2, (2, 4, 16, 16), jnp.float32)
    post_params = 0.5 * jax.random.normal(k3, (2, 8, 8, 8), jnp.float32)
    posteriors = DiagonalGaussianDistribution(post_params)
    weights_full = jnp.abs(jax.random.normal(k4, (2, 4, 16, 16), jnp.float32))

    def run_and_check(loss_mod, x, y, post, weights, tag):
        loss, log = loss_mod(x, y, post, split="train", weights=weights)
        loss = jax.block_until_ready(loss)
        jax.block_until_ready(log)
        ref = _reference(x, y, post, loss_mod.logvar, loss_mod.kl_weight, weights)
        assert jnp.allclose(loss, ref, rtol=1e-4, atol=1e-3), (tag, loss, ref)

    # default large-block config
    loss_mod = MylossPallas(logvar_init=0.0, kl_weight=1.0)
    run_and_check(loss_mod, inputs, reconstructions, posteriors, None, "unweighted")
    run_and_check(loss_mod, inputs, reconstructions, posteriors, weights_full, "weighted-full")
    run_and_check(loss_mod, inputs, reconstructions, posteriors, jnp.float32(0.7), "weighted-scalar")

    # small-block config: exercises multi-step grids + the ragged-last-block mask
    # (rows = 2*4*16*20/128 = 20 -> three blocks of 8 with a masked tail)
    inputs_r = jax.random.normal(k1, (2, 4, 16, 20), jnp.float32)
    recon_r = jax.random.normal(k2, (2, 4, 16, 20), jnp.float32)
    weights_r = jnp.abs(jax.random.normal(k4, (2, 4, 16, 20), jnp.float32))
    loss_small = MylossPallas(logvar_init=0.1, kl_weight=0.5, max_block_rows=8)
    run_and_check(loss_small, inputs_r, recon_r, posteriors, None, "ragged-unweighted")
    run_and_check(loss_small, inputs_r, recon_r, posteriors, weights_r, "ragged-weighted")

    print("KERNEL_OK")
</pallas_src>

<mosaic_0001>
module attributes {stable_mosaic.version = 11 : i64} {
  func.func @_rec_sum_kernel(%arg0: i32, %arg1: memref<16x128xf32, #tpu.memory_space<vmem>>, %arg2: memref<16x128xf32, #tpu.memory_space<vmem>>, %arg3: memref<1x1xf32, #tpu.memory_space<smem>>, %arg4: memref<16x128xf32, #tpu.memory_space<vmem>>) attributes {dimension_semantics = [#tpu.dimension_semantics<arbitrary>], iteration_bounds = array<i64: 1>, scalar_prefetch = 0 : i64, scratch_operands = 1 : i64, tpu.core_type = #tpu.core_type<tc>, window_params = [{transform_indices = @transform_0, window_bounds = array<i64: 16, 128>}, {transform_indices = @transform_1, window_bounds = array<i64: 16, 128>}, {transform_indices = @transform_2, window_bounds = array<i64: 1, 1>}]} {
    %c0_i32 = arith.constant 0 : i32
    %0 = arith.cmpi eq, %arg0, %c0_i32 : i32
    %1 = arith.extui %0 : i1 to i32
    %c0_i32_0 = arith.constant 0 : i32
    %2 = arith.cmpi ne, %1, %c0_i32_0 : i32
    scf.if %2 {
      %cst = arith.constant 0.000000e+00 : f32
      %13 = vector.broadcast %cst : f32 to vector<16x128xf32>
      %c0_10 = arith.constant 0 : index
      %c0_11 = arith.constant 0 : index
      %14 = vector.load %arg4[%c0_10, %c0_11] : memref<16x128xf32, #tpu.memory_space<vmem>>, vector<16x128xf32>
      tpu.vector_store %arg4[%c0_10, %c0_11], %13 {strides = array<i32>} : memref<16x128xf32, #tpu.memory_space<vmem>>, vector<16x128xf32>,
    } else {
    }
    %c0 = arith.constant 0 : index
    %c0_1 = arith.constant 0 : index
    %3 = vector.load %arg1[%c0, %c0_1] : memref<16x128xf32, #tpu.memory_space<vmem>>, vector<16x128xf32>
    %c0_2 = arith.constant 0 : index
    %c0_3 = arith.constant 0 : index
    %4 = vector.load %arg2[%c0_2, %c0_3] : memref<16x128xf32, #tpu.memory_space<vmem>>, vector<16x128xf32>
    %5 = arith.subf %3, %4 : vector<16x128xf32>
    %6 = math.absf %5 : vector<16x128xf32>
    %c0_4 = arith.constant 0 : index
    %c0_5 = arith.constant 0 : index
    %7 = vector.load %arg4[%c0_4, %c0_5] : memref<16x128xf32, #tpu.memory_space<vmem>>, vector<16x128xf32>
    %8 = arith.addf %7, %6 : vector<16x128xf32>
    %c0_6 = arith.constant 0 : index
    %c0_7 = arith.constant 0 : index
    %9 = vector.load %arg4[%c0_6, %c0_7] : memref<16x128xf32, #tpu.memory_space<vmem>>, vector<16x128xf32>
    tpu.vector_store %arg4[%c0_6, %c0_7], %8 {strides = array<i32>} : memref<16x128xf32, #tpu.memory_space<vmem>>, vector<16x128xf32>,
    %c0_i32_8 = arith.constant 0 : i32
    %10 = arith.cmpi eq, %arg0, %c0_i32_8 : i32
    %11 = arith.extui %10 : i1 to i32
    %c0_i32_9 = arith.constant 0 : i32
    %12 = arith.cmpi ne, %11, %c0_i32_9 : i32
    scf.if %12 {
      %c0_10 = arith.constant 0 : index
      %c0_11 = arith.constant 0 : index
      %13 = vector.load %arg4[%c0_10, %c0_11] : memref<16x128xf32, #tpu.memory_space<vmem>>, vector<16x128xf32>
      %14 = vector.shape_cast %13 : vector<16x128xf32> to vector<1x16x128xf32>
      %cst = arith.constant dense<0.000000e+00> : vector<1xf32>
      %15 = vector.multi_reduction <add>, %14, %cst [1, 2] : vector<1x16x128xf32> to vector<1xf32>
      %16 = vector.shape_cast %15 : vector<1xf32> to vector<1x1x1xf32>
      %17 = vector.extract %16[0, 0, 0] : f32 from vector<1x1x1xf32>
      %c0_12 = arith.constant 0 : index
      %c0_13 = arith.constant 0 : index
      %18 = memref.load %arg3[%c0_12, %c0_13] : memref<1x1xf32, #tpu.memory_space<smem>>
      memref.store %17, %arg3[%c0_12, %c0_13] : memref<1x1xf32, #tpu.memory_space<smem>>
    } else {
    }
    return
  }
  func.func @transform_0(%arg0: i32) -> (i32, i32) {
    %c0_i32 = arith.constant 0 : i32
    %c0_i32_0 = arith.constant 0 : i32
    return %arg0, %c0_i32 : i32, i32
  }
  func.func @transform_1(%arg0: i32) -> (i32, i32) {
    %c0_i32 = arith.constant 0 : i32
    %c0_i32_0 = arith.constant 0 : i32
    return %arg0, %c0_i32 : i32, i32
  }
  func.func @transform_2(%arg0: i32) -> (i32, i32) {
    %c0_i32 = arith.constant 0 : i32
    %c0_i32_0 = arith.constant 0 : i32
    %c0_i32_1 = arith.constant 0 : i32
    return %c0_i32, %c0_i32_0 : i32, i32
  }
}

</mosaic_0001>

<bundles_post_ra>
// kernel: tpu_custom_call.1
= control target key start
LH: loop header
LB: loop body
LE: loop exit
PB: predicated region body
PF: predicated region fallthrough
CT: control target
= control target key end

     0   :  { %7 = vsyncpa [#allocation4], 0  ;;  %s215_s0 = inlined_call_operand.hbm [shape: f32[16,128], index: 0, kind: input, shape index: {}]   ;;  %s216_s1 = inlined_call_operand.hbm [shape: f32[16,128], index: 1, kind: input, shape index: {}]   ;;  %s217_s2 = inlined_call_operand.hbm [shape: f32[1,1], index: 2, kind: output, shape index: {}]  }
   0x1   :  { %8 = vsyncpa [#allocation7], 0 }
   0x2   :  { %9 = vsyncpa [#allocation5], 0  ;;  %s159_s9 = smov [#allocation3]   ;;  %s99_s13 = scalar_lea.hbm %s215_s0, 256 }
   0x3   :  { %s15_s10 = sshll.u32 %s159_s9, 4  ;;  %p100_p0 = scmp.ne.s32.totalorder %s215_s0, %s99_s13  ;;  %s16_s10 = int_to_ptr.vmem [resolvable:$true] %s15_s10 }
   0x4   :  { %p103_p1 = scmp.lt.u32.totalorder %s99_s13, %s215_s0 }
   0x6   :  { %p105_p2 = pnand %p103_p1, %p100_p0 }
   0x8   :  { %108 = shalt.err (!%p105_p2)
}
   0x9   :  { %s109_s18 = scalar_lea.vmem %s16_s10, 256  ;;  %p114_p4 = scmp.lt.s32.totalorder %s16_s10, %s16_s10 }
   0xa   :  { %p110_p3 = scmp.ne.s32.totalorder %s16_s10, %s109_s18  ;;  %p115_p5 = scmp.lt.s32.totalorder %s109_s18, %s109_s18 }
   0xc   :  { %p116_p6 = por %p115_p5, %p114_p4 }
   0xe   :  { %p117_p7 = pnand %p116_p6, %p110_p3 }
  0x10   :  { %120 = shalt.err (!%p117_p7)
}
  0x11   :  { %s160_s19 = smov 128   ;;  %s161_s20 = smov 8  }
  0x12   :  { %21 = dma.hbm_to_vmem [thread:$0]  %s215_s0, 256, %s16_s10, [#allocation4], %s160_s19, %s160_s19, %s161_s20  }
  0x13   :  { %s162_s23 = smov [#allocation6]   ;;  %s121_s27 = scalar_lea.hbm %s216_s1, 256 }
  0x14   :  { %s27_s24 = sshll.u32 %s162_s23, 4  ;;  %p122_p8 = scmp.ne.s32.totalorder %s216_s1, %s121_s27  ;;  %s28_s24 = int_to_ptr.vmem [resolvable:$true] %s27_s24 }
  0x15   :  { %p125_p9 = scmp.lt.u32.totalorder %s121_s27, %s216_s1 }
  0x17   :  { %p127_p10 = pnand %p125_p9, %p122_p8 }
  0x19   :  { %130 = shalt.err (!%p127_p10)
}
  0x1a   :  { %s131_s4 = scalar_lea.vmem %s28_s24, 256  ;;  %p136_p12 = scmp.lt.s32.totalorder %s28_s24, %s28_s24 }
  0x1b   :  { %p132_p11 = scmp.ne.s32.totalorder %s28_s24, %s131_s4  ;;  %p137_p13 = scmp.lt.s32.totalorder %s131_s4, %s131_s4 }
  0x1d   :  { %p138_p0 = por %p137_p13, %p136_p12 }
  0x1f   :  { %p139_p1 = pnand %p138_p0, %p132_p11 }
  0x21   :  { %142 = shalt.err (!%p139_p1)
}
  0x22   :  { %33 = dma.hbm_to_vmem [thread:$0]  %s216_s1, 256, %s28_s24, [#allocation7], %s160_s19, %s160_s19, %s161_s20  }
  0x23   :  { %153 = dma.done.wait [#allocation4], 256  }
  0x24   :  { %154 = vsyncadd [#allocation4], 4294967040 }
  0x25   :  { %155 = dma.done.wait [#allocation7], 256  }
  0x26   :  { %156 = vsyncadd [#allocation7], 4294967040  ;;  %v46_v0 = vld [vmem:[#allocation3] sm:$0xff]  ;;  %v47_v1 = vld [vmem:[#allocation3 + $0x8] sm:$0xff]  ;;  %s143_s8 = scalar_lea.hbm %s217_s2, 16 }
  0x27   :  { %v48_v2 = vld [vmem:[#allocation6] sm:$0xff]  ;;  %v49_v3 = vld [vmem:[#allocation6 + $0x8] sm:$0xff]  ;;  %p144_p2 = scmp.ne.s32.totalorder %s217_s2, %s143_s8  ;;  %p147_p3 = scmp.lt.u32.totalorder %s143_s8, %s217_s2 }
  0x28   :  { %v50_v4 = vsub.f32 %v46_v0, %v48_v2  ;;  %v51_v5 = vsub.f32 %v47_v1, %v49_v3 }
  0x29   :  { %p149_p4 = pnand %p147_p3, %p144_p2 }
  0x2a   :  { %v52_v6 = vand.u32 2147483647, %v50_v4  ;;  %v53_v7 = vand.u32 2147483647, %v51_v5 }
  0x2c   :  { %v65_v8 = vadd.f32 %v53_v7, %v52_v6 }
  0x2e   :  { %66 = vadd.xlane.f32.xlu0 %v65_v8 }
  0xbb   :  { %v67_v9 = vpop.xlane.xlu0 %66 }
  0xbc   :  { %v68_v10 = vrot.slane %v67_v9, 4 }
  0xbe   :  { %v69_v11 = vadd.f32 %v68_v10, %v67_v9 }
  0xc0   :  { %v70_v12 = vrot.slane %v69_v11, 2 }
  0xc2   :  { %v71_v13 = vadd.f32 %v70_v12, %v69_v11 }
  0xc4   :  { %v72_v14 = vrot.slane %v71_v13, 1 }
  0xc6   :  { %v73_v15 = vadd.f32 %v72_v14, %v71_v13 }
  0xc8   :  { %92 = vpush %v73_v15 }
  0xf9   :  { %s93_s1 = spop %92 }
  0xfa   :  { %76 = sst [smem:[#allocation8]] %s93_s1 }
  0xfb   :  { %152 = shalt.err (!%p149_p4)
}
  0xfc   :  { %s163_s13 = smov [#allocation8]  }
  0xfd   :  { %84 = dma.smem_to_hbm %s163_s13, 16, %s217_s2, [#allocation5]  }
  0xfe   :  { %157 = dma.done.wait [#allocation5], 16  }
  0xff   :  { %158 = vsyncadd [#allocation5], 4294967280 }
 0x100   :  { %88 = sfence }
 0x101   :  { %89 = vsyncpa [#allocation4], 1 }
 0x102   :  { %90 = vsyncpa [#allocation7], 1 }
 0x103   :  { %91 = vsyncpa [#allocation5], 1 }

</bundles_post_ra>
